<compile_context>
chip_gen: v7x
topology: tpu7x:2x2x1
jax: 0.10.0
libtpu: 0.0.40
codegen_flags: <defaults>
</compile_context>

<pallas_src>
import jax
import jax.numpy as jnp
from jax.experimental import pallas as pl
from jax.experimental.pallas import tpu as pltpu

LN_EPS = 1e-5
_HP = jax.lax.Precision.HIGHEST


def _edge_mlp_kernel(pre_ref, w2_ref, w3_ref, pv_ref, out_ref):
    """One tile of edges, transposed layout [hidden, tile_e].

    pre_ref : (H, TE)  layer-1 pre-activation (W1 @ edge_input + b1), streamed
    w2_ref  : (H, H)   W2^T (VMEM resident)
    w3_ref  : (H, H)   W3^T (VMEM resident)
    pv_ref  : (H, 10)  packed small vectors: g1,be1,b2,g2,be2,b3,g3,be3,w4,b4
    out_ref : (1, TE)  edge scores (lane-dense)
    """
    H = pre_ref.shape[0]
    inv_h = 1.0 / H

    pv = pv_ref[...]                                         # (H, 10)
    # NOTE: a handful of (H,1) lane-extract+broadcasts per grid step; cost is
    # negligible next to the 3x tanh over (H, tile_e) (review: "free, <1%").
    g1, be1 = pv[:, 0:1], pv[:, 1:2]
    b2, g2, be2 = pv[:, 2:3], pv[:, 3:4], pv[:, 4:5]
    b3, g3, be3 = pv[:, 5:6], pv[:, 6:7], pv[:, 7:8]
    w4, b4 = pv[:, 8:9], pv[0:1, 9:10]

    def ln_tanh(h, g, be):
        # LayerNorm over the hidden (sublane) axis, per edge (lane).
        # Single-pass statistics: the two sublane reductions are independent.
        s1 = jnp.sum(h, axis=0, keepdims=True)
        s2 = jnp.sum(h * h, axis=0, keepdims=True)
        mu = s1 * inv_h
        var = jnp.maximum(s2 * inv_h - mu * mu, 0.0)
        hn = (h - mu) * jax.lax.rsqrt(var + LN_EPS)
        return jnp.tanh(hn * g + be)

    # Layer 1 (pre-activation streamed from HBM) -> LN -> tanh
    h = ln_tanh(pre_ref[...], g1, be1)

    # Layer 2 / 3: tiny (H,H) x (H,TE) matmuls + LN + tanh
    h = jnp.dot(w2_ref[...], h, precision=_HP,
                preferred_element_type=jnp.float32) + b2
    h = ln_tanh(h, g2, be2)
    h = jnp.dot(w3_ref[...], h, precision=_HP,
                preferred_element_type=jnp.float32) + b3
    h = ln_tanh(h, g3, be3)

    # Final Linear(hidden -> 1): VPU weighted sublane reduction, lane-dense store.
    out_ref[...] = jnp.sum(h * w4, axis=0, keepdims=True) + b4   # (1, TE)


def edge_network_forward(x, e, edge_index, params, *, tile_e=8192):
    """Pallas implementation of EdgeNetwork.forward.

    x:          [N, D]  node features (float32)
    e:          [E]     edge scalar features (float32)
    edge_index: [2, E]  int32 node indices (start, end)
    params:     dict of MLP parameters (see init_params)
    returns:    [E]     float32 edge scores
    """
    N, D = x.shape
    E = e.shape[0]
    H = params["w1"].shape[1]
    f32 = jnp.float32

    # ---- tile selection: multiple of 128 lanes, >= 2 tiles when possible ----
    e_pad128 = pl.cdiv(E, 128) * 128
    if e_pad128 >= 256:
        # cap so the grid has at least 2 steps (v7x: 2 TCs share the chip).
        max_tile = max(128, ((e_pad128 // 2) // 128) * 128)
    else:
        max_tile = 128
    tile_e = max(128, min((tile_e // 128) * 128, max_tile))
    E_pad = pl.cdiv(E, tile_e) * tile_e
    num_tiles = E_pad // tile_e

    # ---- hoisted node projections + wrapper-side gather (layer 1 folded) ----
    w1 = params["w1"].astype(f32)                 # (2D+1, H)
    w1a, w1b, w1e = w1[:D], w1[D:2 * D], w1[2 * D]
    b1 = params["b1"].astype(f32).reshape(1, H)

    start = edge_index[0].astype(jnp.int32)
    end = edge_index[1].astype(jnp.int32)
    pa = jnp.dot(x.astype(f32), w1a, precision=_HP) + b1        # (N, H)
    pb = jnp.dot(x.astype(f32), w1b, precision=_HP)             # (N, H)
    pre = pa[start] + pb[end] + e.astype(f32)[:, None] * w1e[None, :]  # (E, H)
    preT = pre.T                                                # (H, E)
    if E_pad != E:
        preT = jnp.pad(preT, ((0, 0), (0, E_pad - E)))          # (H, E_pad)

    # ---- small resident parameters -----------------------------------------
    w2T = params["w2"].astype(f32).T                            # (H, H)
    w3T = params["w3"].astype(f32).T                            # (H, H)
    pvec = jnp.concatenate(
        [params["g1"].astype(f32).T, params["be1"].astype(f32).T,
         params["b2"].astype(f32).T, params["g2"].astype(f32).T,
         params["be2"].astype(f32).T,
         params["b3"].astype(f32).T, params["g3"].astype(f32).T,
         params["be3"].astype(f32).T,
         params["w4"].astype(f32),
         jnp.broadcast_to(params["b4"].astype(f32), (H, 1))],
        axis=1)                                                 # (H, 10)

    # ---- explicit VMEM budget (double-buffered streams + activations) -------
    vmem_bytes = int(2 * 2 * H * tile_e * 4        # double-buffered pre tiles
                     + 2 * 2 * tile_e * 4          # double-buffered out tiles
                     + 16 * H * tile_e * 4         # activation headroom
                     + (2 * H * H + 10 * H) * 4
                     + (1 << 20))
    vmem_bytes = min(max(vmem_bytes, 32 << 20), 64 << 20)   # v7x-safe ceiling

    cost = pl.CostEstimate(
        flops=int(E_pad) * int(4 * H * H + 30 * H + 8),
        transcendentals=int(E_pad) * int(3 * H + 3),
        bytes_accessed=int(E_pad) * (H + 1) * 4 + (2 * H * H + 10 * H) * 4,
    )

    whole = lambda shape: pl.BlockSpec(shape, lambda i: (0, 0))

    out = pl.pallas_call(
        _edge_mlp_kernel,
        out_shape=jax.ShapeDtypeStruct((1, E_pad), f32),
        grid_spec=pltpu.PrefetchScalarGridSpec(
            num_scalar_prefetch=0,
            grid=(num_tiles,),
            in_specs=[
                pl.BlockSpec((H, tile_e), lambda i: (0, i)),   # pre tile
                whole((H, H)),                                 # W2^T
                whole((H, H)),                                 # W3^T
                whole((H, 10)),                                # packed vectors
            ],
            out_specs=pl.BlockSpec((1, tile_e), lambda i: (0, i)),  # lane-dense
        ),
        compiler_params=pltpu.CompilerParams(
            dimension_semantics=("parallel",),
            vmem_limit_bytes=vmem_bytes),
        cost_estimate=cost,
    )(preT, w2T, w3T, pvec)

    return out.reshape(E_pad)[:E]


def init_params(key, input_dim, hidden_dim=8):
    """Deterministic synthetic init matching the nn.Linear / LayerNorm shapes."""
    d_in = 2 * input_dim + 1
    ks = jax.random.split(key, 8)

    def lin(k, fan_in, fan_out):
        kw, kb = jax.random.split(k)
        lim = 1.0 / jnp.sqrt(fan_in)
        w = jax.random.uniform(kw, (fan_in, fan_out), jnp.float32, -lim, lim)
        b = jax.random.uniform(kb, (1, fan_out), jnp.float32, -lim, lim)
        return w, b

    w1, b1 = lin(ks[0], d_in, hidden_dim)
    w2, b2 = lin(ks[1], hidden_dim, hidden_dim)
    w3, b3 = lin(ks[2], hidden_dim, hidden_dim)
    w4, b4 = lin(ks[3], hidden_dim, 1)

    ones = jnp.ones((1, hidden_dim), jnp.float32)
    zeros = jnp.zeros((1, hidden_dim), jnp.float32)
    return dict(
        w1=w1, b1=b1, g1=ones, be1=zeros,
        w2=w2, b2=b2, g2=ones, be2=zeros,
        w3=w3, b3=b3, g3=ones, be3=zeros,
        w4=w4, b4=b4,
    )


def edge_network_reference(x, e, edge_index, params):
    """Pure-JAX reference of the same forward pass (for correctness check)."""
    start, end = edge_index[0], edge_index[1]
    h = jnp.concatenate([x[start], x[end], e[:, None]], axis=1)

    def ln_tanh(h, g, b):
        mu = jnp.mean(h, axis=-1, keepdims=True)
        var = jnp.mean((h - mu) ** 2, axis=-1, keepdims=True)
        return jnp.tanh((h - mu) / jnp.sqrt(var + LN_EPS) * g + b)

    h = ln_tanh(jnp.dot(h, params["w1"], precision=_HP) + params["b1"],
                params["g1"], params["be1"])
    h = ln_tanh(jnp.dot(h, params["w2"], precision=_HP) + params["b2"],
                params["g2"], params["be2"])
    h = ln_tanh(jnp.dot(h, params["w3"], precision=_HP) + params["b3"],
                params["g3"], params["be3"])
    return (jnp.dot(h, params["w4"], precision=_HP) + params["b4"])[:, 0]


if __name__ == "__main__":
    key = jax.random.PRNGKey(0)
    k_x, k_e, k_s, k_t, k_p = jax.random.split(key, 5)

    input_dim = 16
    hidden_dim = 8
    num_nodes = 32
    num_edges = 200  # not a multiple of 128: exercises edge padding + 2 tiles

    x = jax.random.normal(k_x, (num_nodes, input_dim), jnp.float32)
    e = jax.random.normal(k_e, (num_edges,), jnp.float32)
    start = jax.random.randint(k_s, (num_edges,), 0, num_nodes, jnp.int32)
    end = jax.random.randint(k_t, (num_edges,), 0, num_nodes, jnp.int32)
    edge_index = jnp.stack([start, end], axis=0)

    params = init_params(k_p, input_dim, hidden_dim)

    out = edge_network_forward(x, e, edge_index, params)
    out = jax.block_until_ready(out)

    ref = edge_network_reference(x, e, edge_index, params)
    assert out.shape == (num_edges,)
    err = float(jnp.max(jnp.abs(out - ref)))
    assert jnp.allclose(out, ref, atol=5e-4, rtol=5e-4), err

    print("KERNEL_OK")
</pallas_src>

<mosaic_0001>
module attributes {stable_mosaic.version = 11 : i64} {
  func.func @_edge_mlp_kernel(%arg0: i32, %arg1: memref<8x128xf32, #tpu.memory_space<vmem>>, %arg2: memref<8x8xf32, #tpu.memory_space<vmem>>, %arg3: memref<8x8xf32, #tpu.memory_space<vmem>>, %arg4: memref<8x10xf32, #tpu.memory_space<vmem>>, %arg5: memref<1x128xf32, #tpu.memory_space<vmem>>) attributes {dimension_semantics = [#tpu.dimension_semantics<parallel>], iteration_bounds = array<i64: 2>, scalar_prefetch = 0 : i64, scratch_operands = 0 : i64, tpu.core_type = #tpu.core_type<tc>, window_params = [{transform_indices = @transform_0, window_bounds = array<i64: 8, 128>}, {pipeline_mode = #tpu.pipeline_mode<synchronous>, transform_indices = @transform_1, window_bounds = array<i64: 8, 8>}, {pipeline_mode = #tpu.pipeline_mode<synchronous>, transform_indices = @transform_2, window_bounds = array<i64: 8, 8>}, {pipeline_mode = #tpu.pipeline_mode<synchronous>, transform_indices = @transform_3, window_bounds = array<i64: 8, 10>}, {transform_indices = @transform_4, window_bounds = array<i64: 1, 128>}]} {
    %c0 = arith.constant 0 : index
    %c0_0 = arith.constant 0 : index
    %0 = vector.load %arg4[%c0, %c0_0] : memref<8x10xf32, #tpu.memory_space<vmem>>, vector<8x10xf32>
    %1 = vector.extract_strided_slice %0 {offsets = [0, 0], sizes = [8, 1], strides = [1, 1]} : vector<8x10xf32> to vector<8x1xf32>
    %2 = vector.extract_strided_slice %0 {offsets = [0, 1], sizes = [8, 1], strides = [1, 1]} : vector<8x10xf32> to vector<8x1xf32>
    %3 = vector.extract_strided_slice %0 {offsets = [0, 2], sizes = [8, 1], strides = [1, 1]} : vector<8x10xf32> to vector<8x1xf32>
    %4 = vector.extract_strided_slice %0 {offsets = [0, 3], sizes = [8, 1], strides = [1, 1]} : vector<8x10xf32> to vector<8x1xf32>
    %5 = vector.extract_strided_slice %0 {offsets = [0, 4], sizes = [8, 1], strides = [1, 1]} : vector<8x10xf32> to vector<8x1xf32>
    %6 = vector.extract_strided_slice %0 {offsets = [0, 5], sizes = [8, 1], strides = [1, 1]} : vector<8x10xf32> to vector<8x1xf32>
    %7 = vector.extract_strided_slice %0 {offsets = [0, 6], sizes = [8, 1], strides = [1, 1]} : vector<8x10xf32> to vector<8x1xf32>
    %8 = vector.extract_strided_slice %0 {offsets = [0, 7], sizes = [8, 1], strides = [1, 1]} : vector<8x10xf32> to vector<8x1xf32>
    %9 = vector.extract_strided_slice %0 {offsets = [0, 8], sizes = [8, 1], strides = [1, 1]} : vector<8x10xf32> to vector<8x1xf32>
    %10 = vector.extract_strided_slice %0 {offsets = [0, 9], sizes = [1, 1], strides = [1, 1]} : vector<8x10xf32> to vector<1x1xf32>
    %c0_1 = arith.constant 0 : index
    %c0_2 = arith.constant 0 : index
    %11 = vector.load %arg1[%c0_1, %c0_2] : memref<8x128xf32, #tpu.memory_space<vmem>>, vector<8x128xf32>
    %cst = arith.constant dense<0.000000e+00> : vector<128xf32>
    %12 = vector.multi_reduction <add>, %11, %cst [0] : vector<8x128xf32> to vector<128xf32>
    %13 = vector.shape_cast %12 : vector<128xf32> to vector<1x128xf32>
    %14 = arith.mulf %11, %11 : vector<8x128xf32>
    %cst_3 = arith.constant dense<0.000000e+00> : vector<128xf32>
    %15 = vector.multi_reduction <add>, %14, %cst_3 [0] : vector<8x128xf32> to vector<128xf32>
    %16 = vector.shape_cast %15 : vector<128xf32> to vector<1x128xf32>
    %cst_4 = arith.constant 1.250000e-01 : f32
    %17 = vector.broadcast %cst_4 : f32 to vector<1x128xf32>
    %18 = arith.mulf %13, %17 : vector<1x128xf32>
    %cst_5 = arith.constant 1.250000e-01 : f32
    %19 = vector.broadcast %cst_5 : f32 to vector<1x128xf32>
    %20 = arith.mulf %16, %19 : vector<1x128xf32>
    %21 = arith.mulf %18, %18 : vector<1x128xf32>
    %22 = arith.subf %20, %21 : vector<1x128xf32>
    %cst_6 = arith.constant 0.000000e+00 : f32
    %23 = vector.broadcast %cst_6 : f32 to vector<1x128xf32>
    %24 = arith.maximumf %22, %23 : vector<1x128xf32>
    %25 = vector.broadcast %18 : vector<1x128xf32> to vector<8x128xf32>
    %26 = arith.subf %11, %25 : vector<8x128xf32>
    %cst_7 = arith.constant 9.99999974E-6 : f32
    %27 = vector.broadcast %cst_7 : f32 to vector<1x128xf32>
    %28 = arith.addf %24, %27 : vector<1x128xf32>
    %29 = math.rsqrt %28 : vector<1x128xf32>
    %30 = vector.broadcast %29 : vector<1x128xf32> to vector<8x128xf32>
    %31 = arith.mulf %26, %30 : vector<8x128xf32>
    %32 = vector.broadcast %1 : vector<8x1xf32> to vector<8x128xf32>
    %33 = arith.mulf %31, %32 : vector<8x128xf32>
    %34 = vector.broadcast %2 : vector<8x1xf32> to vector<8x128xf32>
    %35 = arith.addf %33, %34 : vector<8x128xf32>
    %36 = math.tanh %35 : vector<8x128xf32>
    %c0_8 = arith.constant 0 : index
    %c0_9 = arith.constant 0 : index
    %37 = vector.load %arg2[%c0_8, %c0_9] : memref<8x8xf32, #tpu.memory_space<vmem>>, vector<8x8xf32>
    %cst_10 = arith.constant dense<0.000000e+00> : vector<8x128xf32>
    %38 = tpu.matmul %37, %36, %cst_10 {dimension_numbers = #tpu.dot_dimension_numbers<[1], [0], [0], [1], [0, 0, 1, 1], [], []>, precision = #tpu.contract_precision<fp32>} : vector<8x8xf32>, vector<8x128xf32>, vector<8x128xf32> -> vector<8x128xf32>
    %39 = vector.broadcast %3 : vector<8x1xf32> to vector<8x128xf32>
    %40 = arith.addf %38, %39 : vector<8x128xf32>
    %cst_11 = arith.constant dense<0.000000e+00> : vector<128xf32>
    %41 = vector.multi_reduction <add>, %40, %cst_11 [0] : vector<8x128xf32> to vector<128xf32>
    %42 = vector.shape_cast %41 : vector<128xf32> to vector<1x128xf32>
    %43 = arith.mulf %40, %40 : vector<8x128xf32>
    %cst_12 = arith.constant dense<0.000000e+00> : vector<128xf32>
    %44 = vector.multi_reduction <add>, %43, %cst_12 [0] : vector<8x128xf32> to vector<128xf32>
    %45 = vector.shape_cast %44 : vector<128xf32> to vector<1x128xf32>
    %cst_13 = arith.constant 1.250000e-01 : f32
    %46 = vector.broadcast %cst_13 : f32 to vector<1x128xf32>
    %47 = arith.mulf %42, %46 : vector<1x128xf32>
    %cst_14 = arith.constant 1.250000e-01 : f32
    %48 = vector.broadcast %cst_14 : f32 to vector<1x128xf32>
    %49 = arith.mulf %45, %48 : vector<1x128xf32>
    %50 = arith.mulf %47, %47 : vector<1x128xf32>
    %51 = arith.subf %49, %50 : vector<1x128xf32>
    %cst_15 = arith.constant 0.000000e+00 : f32
    %52 = vector.broadcast %cst_15 : f32 to vector<1x128xf32>
    %53 = arith.maximumf %51, %52 : vector<1x128xf32>
    %54 = vector.broadcast %47 : vector<1x128xf32> to vector<8x128xf32>
    %55 = arith.subf %40, %54 : vector<8x128xf32>
    %cst_16 = arith.constant 9.99999974E-6 : f32
    %56 = vector.broadcast %cst_16 : f32 to vector<1x128xf32>
    %57 = arith.addf %53, %56 : vector<1x128xf32>
    %58 = math.rsqrt %57 : vector<1x128xf32>
    %59 = vector.broadcast %58 : vector<1x128xf32> to vector<8x128xf32>
    %60 = arith.mulf %55, %59 : vector<8x128xf32>
    %61 = vector.broadcast %4 : vector<8x1xf32> to vector<8x128xf32>
    %62 = arith.mulf %60, %61 : vector<8x128xf32>
    %63 = vector.broadcast %5 : vector<8x1xf32> to vector<8x128xf32>
    %64 = arith.addf %62, %63 : vector<8x128xf32>
    %65 = math.tanh %64 : vector<8x128xf32>
    %c0_17 = arith.constant 0 : index
    %c0_18 = arith.constant 0 : index
    %66 = vector.load %arg3[%c0_17, %c0_18] : memref<8x8xf32, #tpu.memory_space<vmem>>, vector<8x8xf32>
    %cst_19 = arith.constant dense<0.000000e+00> : vector<8x128xf32>
    %67 = tpu.matmul %66, %65, %cst_19 {dimension_numbers = #tpu.dot_dimension_numbers<[1], [0], [0], [1], [0, 0, 1, 1], [], []>, precision = #tpu.contract_precision<fp32>} : vector<8x8xf32>, vector<8x128xf32>, vector<8x128xf32> -> vector<8x128xf32>
    %68 = vector.broadcast %6 : vector<8x1xf32> to vector<8x128xf32>
    %69 = arith.addf %67, %68 : vector<8x128xf32>
    %cst_20 = arith.constant dense<0.000000e+00> : vector<128xf32>
    %70 = vector.multi_reduction <add>, %69, %cst_20 [0] : vector<8x128xf32> to vector<128xf32>
    %71 = vector.shape_cast %70 : vector<128xf32> to vector<1x128xf32>
    %72 = arith.mulf %69, %69 : vector<8x128xf32>
    %cst_21 = arith.constant dense<0.000000e+00> : vector<128xf32>
    %73 = vector.multi_reduction <add>, %72, %cst_21 [0] : vector<8x128xf32> to vector<128xf32>
    %74 = vector.shape_cast %73 : vector<128xf32> to vector<1x128xf32>
    %cst_22 = arith.constant 1.250000e-01 : f32
    %75 = vector.broadcast %cst_22 : f32 to vector<1x128xf32>
    %76 = arith.mulf %71, %75 : vector<1x128xf32>
    %cst_23 = arith.constant 1.250000e-01 : f32
    %77 = vector.broadcast %cst_23 : f32 to vector<1x128xf32>
    %78 = arith.mulf %74, %77 : vector<1x128xf32>
    %79 = arith.mulf %76, %76 : vector<1x128xf32>
    %80 = arith.subf %78, %79 : vector<1x128xf32>
    %cst_24 = arith.constant 0.000000e+00 : f32
    %81 = vector.broadcast %cst_24 : f32 to vector<1x128xf32>
    %82 = arith.maximumf %80, %81 : vector<1x128xf32>
    %83 = vector.broadcast %76 : vector<1x128xf32> to vector<8x128xf32>
    %84 = arith.subf %69, %83 : vector<8x128xf32>
    %cst_25 = arith.constant 9.99999974E-6 : f32
    %85 = vector.broadcast %cst_25 : f32 to vector<1x128xf32>
    %86 = arith.addf %82, %85 : vector<1x128xf32>
    %87 = math.rsqrt %86 : vector<1x128xf32>
    %88 = vector.broadcast %87 : vector<1x128xf32> to vector<8x128xf32>
    %89 = arith.mulf %84, %88 : vector<8x128xf32>
    %90 = vector.broadcast %7 : vector<8x1xf32> to vector<8x128xf32>
    %91 = arith.mulf %89, %90 : vector<8x128xf32>
    %92 = vector.broadcast %8 : vector<8x1xf32> to vector<8x128xf32>
    %93 = arith.addf %91, %92 : vector<8x128xf32>
    %94 = math.tanh %93 : vector<8x128xf32>
    %95 = vector.broadcast %9 : vector<8x1xf32> to vector<8x128xf32>
    %96 = arith.mulf %94, %95 : vector<8x128xf32>
    %cst_26 = arith.constant dense<0.000000e+00> : vector<128xf32>
    %97 = vector.multi_reduction <add>, %96, %cst_26 [0] : vector<8x128xf32> to vector<128xf32>
    %98 = vector.shape_cast %97 : vector<128xf32> to vector<1x128xf32>
    %99 = vector.broadcast %10 : vector<1x1xf32> to vector<1x128xf32>
    %100 = arith.addf %98, %99 : vector<1x128xf32>
    %c0_27 = arith.constant 0 : index
    %c0_28 = arith.constant 0 : index
    %101 = vector.load %arg5[%c0_27, %c0_28] : memref<1x128xf32, #tpu.memory_space<vmem>>, vector<1x128xf32>
    tpu.vector_store %arg5[%c0_27, %c0_28], %100 {strides = array<i32>} : memref<1x128xf32, #tpu.memory_space<vmem>>, vector<1x128xf32>,
    return
  }
  func.func @transform_0(%arg0: i32) -> (i32, i32) {
    %c0_i32 = arith.constant 0 : i32
    %c0_i32_0 = arith.constant 0 : i32
    return %c0_i32, %arg0 : i32, i32
  }
  func.func @transform_1(%arg0: i32) -> (i32, i32) {
    %c0_i32 = arith.constant 0 : i32
    %c0_i32_0 = arith.constant 0 : i32
    %c0_i32_1 = arith.constant 0 : i32
    return %c0_i32, %c0_i32_0 : i32, i32
  }
  func.func @transform_2(%arg0: i32) -> (i32, i32) {
    %c0_i32 = arith.constant 0 : i32
    %c0_i32_0 = arith.constant 0 : i32
    %c0_i32_1 = arith.constant 0 : i32
    return %c0_i32, %c0_i32_0 : i32, i32
  }
  func.func @transform_3(%arg0: i32) -> (i32, i32) {
    %c0_i32 = arith.constant 0 : i32
    %c0_i32_0 = arith.constant 0 : i32
    %c0_i32_1 = arith.constant 0 : i32
    return %c0_i32, %c0_i32_0 : i32, i32
  }
  func.func @transform_4(%arg0: i32) -> (i32, i32) {
    %c0_i32 = arith.constant 0 : i32
    %c0_i32_0 = arith.constant 0 : i32
    return %c0_i32, %arg0 : i32, i32
  }
}

</mosaic_0001>

<bundles_post_ra>
// kernel: tpu_custom_call.1
= control target key start
LH: loop header
LB: loop body
LE: loop exit
PB: predicated region body
PF: predicated region fallthrough
CT: control target
= control target key end

     0   :  { %9 = vsyncpa [#allocation3], 0  ;;  %s2063_s0 = inlined_call_operand.hbm [shape: f32[8,256], index: 0, kind: input, shape index: {}]   ;;  %s2064_s1 = inlined_call_operand.hbm [shape: f32[8,8], index: 1, kind: input, shape index: {}]   ;;  %s2065_s2 = inlined_call_operand.hbm [shape: f32[8,8], index: 2, kind: input, shape index: {}]   ;;  %s2066_s3 = inlined_call_operand.vmem [shape: f32[8,10], index: 3, kind: input, shape index: {}]   ;;  %s2067_s4 = inlined_call_operand.hbm [shape: f32[1,256], index: 4, kind: output, shape index: {}]  }
   0x1   :  { %11 = vsyncpa [#allocation3 + $0x1], 0 }
   0x2   :  { %12 = vsyncpa [#allocation6], 0 }
   0x3   :  { %13 = vsyncpa [#allocation4], 0 }
   0x4   :  { %15 = vsyncpa [#allocation4 + $0x1], 0  ;;  %s1784_s15 = smov 0   ;;  %s1786_s16 = smov 0  }
   0x5   :  { %s1788_s17 = smov 0   ;;  %s1790_s18 = smov 0  }
   0x6 LB: > { %s1805_s19 = sadd.s32 4294967295, %s1741_s18   ;;  %s1363_s20 = sadd.s32 4294967294, %s1741_s18   ;;  %s1741_s18 = sphi %s1790_s18, %s2087_s18   ;;  %s1737_s17 = sphi %s1788_s17, %s2086_s17   ;;  %s1733_s16 = sphi %s1786_s16, %s2085_s16   ;;  %s1729_s15 = sphi %s1784_s15, %s2084_s15  }
   0x7   : > { %p41_p0 = scmp.ne.s32.totalorder %s1733_s16, %s1729_s15  ;;  %p2068_p1 = scmp.eq.s32.totalorder %s1805_s19, 0 }
   0x8   : > { %p134_p3 = scmp.eq.s32.totalorder %s1363_s20, 1  ;;  %p1364_p5 = scmp.ge.s32.totalorder %s1741_s18, 1 }
   0x9   : > { %p1814_p4 = por %p2068_p1, %p41_p0  ;;  %p141_p7 = scmp.lt.s32.totalorder %s1741_s18, 3 }
   0xa   : > { %p1819_p6 = por %p134_p3, %p41_p0  ;;  %s1743_s24 = smov [#allocation5]  }
   0xb   : > { %s2071_s21 = scalar_select %p1814_p4, 1, 0 }
   0xc   : > { %s2072_s22 = scalar_select %p1819_p6, 1, 0 }
   0xd   : > { %p1824_p8 = pnand %p1364_p5, %p141_p7  ;;  %s154_s25 = sshll.u32 %s1743_s24, 4  ;;  %s155_s25 = int_to_ptr.vmem [resolvable:$true] %s154_s25 }
   0xe   : > { %s1744_s26 = smov [#allocation7]   ;;  %s1840_s29 = sadd.s32 1, %s1741_s18  }
   0xf   : > { %s2073_s23 = scalar_select %p1824_p8, 1, 0 }
  0x10   : > { %p1495_p10 = pneg %p1824_p8  ;;  %s165_s27 = sshll.u32 %s1744_s26, 4  ;;  %s1837_s27 = int_to_ptr.vmem [resolvable:$true] %s165_s27 }
  0x11   : > { %s25_s30 = ssub.s32 %s1741_s18, %s1840_s29  ;;  %s1585_s7 = scalar_lea.hbm %s2064_s1, 128 }
  0x12   : > { %p1833_p11 = pnand %p1495_p10, %p2068_p1  ;;  %p1586_p12 = scmp.ne.s32.totalorder %s2064_s1, %s1585_s7 }
  0x13   : > { %p1592_p5 = scmp.lt.u32.totalorder %s1585_s7, %s2064_s1 }
  0x14   : > { %p1587_p13 = pneg %p1833_p11 }
  0x16   : > { %p1588_p0 = pnand %p1587_p13, %p1586_p12 }
  0x18   : > { %p1589_p3 = pneg %p1588_p0 }
  0x1a   : > { %p1594_p7 = pnand %p1592_p5, %p1589_p3 }
  0x1c   : > { %1597 = shalt.err (!%p1594_p7)
}
  0x1d   : > { %s1598_s12 = scalar_lea.vmem %s155_s25, 128  ;;  %p1606_p2 = scmp.lt.s32.totalorder %s155_s25, %s155_s25 }
  0x1e   : > { %p1599_p10 = scmp.ne.s32.totalorder %s155_s25, %s1598_s12  ;;  %p1607_p6 = scmp.lt.s32.totalorder %s1598_s12, %s1598_s12 }
  0x20   : > { %p1601_p9 = pnand %p1599_p10, %p1587_p13  ;;  %p1608_p4 = por %p1607_p6, %p1606_p2 }
  0x22   : > { %p1602_p1 = pneg %p1601_p9 }
  0x24   : > { %p1609_p8 = pnand %p1608_p4, %p1602_p1 }
  0x26   : > { %1612 = shalt.err (!%p1609_p8)
}
  0x27   : > { %1498 = dma.hbm_to_vmem [thread:$0]  (!%p1833_p11), %s2064_s1, 128, %s155_s25, [#allocation6]  }
  0x28   : > { %s1613_s26 = scalar_lea.hbm %s2065_s2, 128 }
  0x29   : > { %p1614_p9 = scmp.ne.s32.totalorder %s2065_s2, %s1613_s26  ;;  %p1620_p4 = scmp.lt.u32.totalorder %s1613_s26, %s2065_s2 }
  0x2b   : > { %p1616_p2 = pnand %p1614_p9, %p1587_p13 }
  0x2d   : > { %p1617_p1 = pneg %p1616_p2 }
  0x2f   : > { %p1622_p6 = pnand %p1620_p4, %p1617_p1 }
  0x31   : > { %1625 = shalt.err (!%p1622_p6)
}
  0x32   : > { %s1626_s25 = scalar_lea.vmem %s1837_s27, 128  ;;  %p1634_p3 = scmp.lt.s32.totalorder %s1837_s27, %s1837_s27 }
  0x33   : > { %p1627_p8 = scmp.ne.s32.totalorder %s1837_s27, %s1626_s25  ;;  %p1635_p5 = scmp.lt.s32.totalorder %s1626_s25, %s1626_s25 }
  0x35   : > { %p1629_p12 = pnand %p1627_p8, %p1587_p13  ;;  %p1636_p7 = por %p1635_p5, %p1634_p3 }
  0x37   : > { %p1630_p0 = pneg %p1629_p12 }
  0x39   : > { %p1637_p10 = pnand %p1636_p7, %p1630_p0 }
  0x3b   : > { %1640 = shalt.err (!%p1637_p10)
}
  0x3c   : > { %1501 = dma.hbm_to_vmem [thread:$0]  (!%p1833_p11), %s2065_s2, 128, %s1837_s27, [#allocation6]  }
  0x3d   : > { %p26_p13 = scmp.eq.s32.totalorder %s25_s30, 0  ;;  %s28_s11 = sadd.s32 1, %s1737_s17 }
  0x3e   : > { %p35_p9 = scmp.ne.s32.totalorder %s1737_s17, %s1733_s16  ;;  %p36_p2 = scmp.eq.s32.totalorder %s1741_s18, 0 }
  0x3f   : > { %s1899_s28 = scalar_select %p26_p13, %s1737_s17, %s28_s11  }
  0x40   : > { %p37_p1 = por %p36_p2, %p35_p9  ;;  %p2075_p4 = scmp.eq.s32.totalorder %s1805_s19, 1 }
  0x41   : > { %p1512_p8 = scmp.lt.s32.totalorder %s1741_s18, 2  ;;  %s179_s13 = sand.u32 1, %s1737_s17  }
  0x42   : > { %p1903_p6 = por %p2075_p4, %p35_p9  ;;  %s1368_s14 = sshll.u32 %s179_s13, 3 }
  0x43   : > { %s1369_s20 = sshll.u32 %s1741_s18, 7  ;;  %s183_s30 = scalar_lea.vmem [#allocation2], %s1368_s14 }
  0x44   : > { %s1913_s27 = scalar_lea.hbm %s2063_s0, %s1369_s20  ;;  %s190_s5 = sshll.u32 %s183_s30, 4  ;;  %s1915_s5 = int_to_ptr.vmem [resolvable:$true] %s190_s5 }
  0x45   : > { %p1917_p11 = pnand %p1512_p8, %p37_p1  ;;  %s180_s7 = scalar_lea.sflag [#allocation3], %s179_s13 }
  0x46   : > { %s1641_s8 = scalar_lea.hbm %s1913_s27, 128  ;;  %s1646_s10 = scalar_lea.hbm %s2063_s0, 256 }
  0x47   : > { %p1642_p12 = scmp.ne.s32.totalorder %s1913_s27, %s1641_s8  ;;  %p1643_p0 = pneg %p1917_p11 }
  0x48   : > { %p1647_p7 = scmp.lt.u32.totalorder %s1913_s27, %s2063_s0  ;;  %p1648_p10 = scmp.lt.u32.totalorder %s1646_s10, %s1641_s8 }
  0x49   : > { %p1644_p3 = pnand %p1643_p0, %p1642_p12  ;;  %p1650_p9 = scmp.lt.u32.totalorder %s1641_s8, %s1913_s27 }
  0x4a   : > { %p1649_p13 = por %p1648_p10, %p1647_p7 }
  0x4b   : > { %p1645_p5 = pneg %p1644_p3 }
  0x4c   : > { %p1651_p2 = por %p1650_p9, %p1649_p13 }
  0x4e   : > { %p1652_p1 = pnand %p1651_p2, %p1645_p5 }
  0x50   : > { %1655 = shalt.err (!%p1652_p1)
}
  0x51   : > { %s1656_s13 = scalar_lea.vmem %s1915_s5, 128  ;;  %s1745_s20 = smov [#allocation2]  }
  0x52   : > { %p1657_p4 = scmp.ne.s32.totalorder %s1915_s5, %s1656_s13  ;;  %s1661_s24 = sshll.u32 %s1745_s20, 4  ;;  %s1662_s24 = int_to_ptr.vmem [resolvable:$false] %s1661_s24 }
  0x53   : > { %s1663_s26 = scalar_lea.vmem %s1662_s24, 256  ;;  %p1664_p3 = scmp.lt.s32.totalorder %s1915_s5, %s1662_s24 }
  0x54   : > { %p1659_p8 = pnand %p1657_p4, %p1643_p0  ;;  %p1665_p7 = scmp.lt.s32.totalorder %s1663_s26, %s1656_s13 }
  0x56   : > { %p1660_p12 = pneg %p1659_p8  ;;  %p1666_p10 = por %p1665_p7, %p1664_p3 }
  0x58   : > { %p1667_p13 = pnand %p1666_p10, %p1660_p12 }
  0x5a   : > { %1670 = shalt.err (!%p1667_p13)
}
  0x5b   : > { %1505 = dma.hbm_to_vmem [thread:$0]  (!%p1917_p11), %s1913_s27, 128, %s1915_s5, %s180_s7  }
  0x5c   : > { %p2078_p5 = scmp.ne.s32.totalorder %s2073_s23, 0 }
  0x5d   : > { %s1949_s30 = sand.u32 (!%p2078_p5), 1, %s1733_s16   ;;  %p2079_p0 = scmp.ne.s32.totalorder (!%p2078_p5), %s2071_s21, 0 }
  0x5e   : > { %199 = sbr.rel (%p2078_p5) target bundleno = 897 (0x381), region = 36  ;;  %s1371_s8 = sshll.u32 (!%p2078_p5), %s1949_s30, 3 }
  0x5f   : > { %s202_s25 = scalar_lea.sflag (!%p2078_p5), [#allocation3], %s1949_s30  ;;  %s205_s9 = scalar_lea.vmem (!%p2078_p5), [#allocation2], %s1371_s8 }
  0x65   : > { %1716 = dma.done.wait (%p2079_p0), %s202_s25, 128  }
  0x66   : > { %1718 = vsyncadd (%p2079_p0), %s202_s25, 4294967168  ;;  %p2080_p9 = scmp.eq.s32.totalorder %s1805_s19, 0 }
  0x68   : > { %1720 = dma.done.wait (%p2080_p9), [#allocation6], 256   ;;  %p2081_p11 = pmov %p2080_p9 }
  0x69   : > { %v1746_v0 = vmov 0   ;;  %v1964_v1 = vld [vmem:[%s2066_s3] sm:$0xff]  ;;  %v1747_v2 = vmov 1   ;;  %v1748_v3 = vmov 0.0   ;;  %vm1749_vm0 = vmmov 0   ;;  %v273_v28 = vld [vmem:[#allocation5] sm:$0xff] }
  0x6a   : > { %1722 = vsyncadd (%p2081_p11), [#allocation6], 4294967040  ;;  %1562 = vset.pattern.permute.xlu0 %v1746_v0  ;;  %1401 = vmatprep.subr.mxu0 %v1748_v3  ;;  %v1750_v4 = vmov 2   ;;  %v238_v5 = vld [vmem:[%s205_s9] sm:$0xff]  ;;  %v1751_v6 = vmov 3   ;;  %v1752_v9 = vmov 4  }
  0x6b   : > { %263 = vperm.xlu0 %1562, %v1964_v1   ;;  %1431 = vmatprep.subr.mxu1 %v1748_v3  ;;  %v239_v7 = vrot.slane %v238_v5, 4  ;;  %v245_v8 = vmul.f32 %v238_v5, %v238_v5  ;;  %vm278_vm1 = vcmask 64512   ;;  %v1753_v47 = vmov 5   ;;  %s1374_s21 = sshll.u32 %s1805_s19, 4  ;;  %s236_s5 = scalar_lea.vmem [#allocation8], %s1949_s30 }
  0x6c   : > { %1403 = vmatprep.mubr.msk.f32.mxu0 %vm1749_vm0, %v1748_v3  ;;  %1433 = vmatprep.mubr.msk.f32.mxu1 %vm1749_vm0, %v1748_v3  ;;  %v280_v30 = vsel %vm278_vm1, %v273_v28, 0  ;;  %v1754_v48 = vmov 6   ;;  %v1755_v49 = vmov 7   ;;  %v1756_v50 = vmov 8   ;;  %s1278_s6 = sshll.u32 %s236_s5, 4  ;;  %s2019_s11 = scalar_lea.hbm %s2067_s4, %s1374_s21  ;;  %s2021_s6 = int_to_ptr.vmem [resolvable:$true] %s1278_s6 }
  0x6d   : > { %1564 = vset.pattern.permute.xlu1 %v1750_v4  ;;  %v240_v10 = vadd.f32 %v239_v7, %v238_v5  ;;  %v246_v11 = vrot.slane %v245_v8, 4  ;;  %v348_v33 = vand.u32 4294901760, %v280_v30  ;;  %v1757_v51 = vmov 9   ;;  %s1266_s14 = scalar_lea.sflag [#allocation4], %s1949_s30  ;;  %s1671_s13 = scalar_lea.vmem %s2021_s6, 16 }
  0x6e   : > { %275 = vperm.xlu1 %1564, %v1964_v1   ;;  %p1672_p2 = scmp.ne.s32.totalorder %s2021_s6, %s1671_s13  ;;  %s1758_s19 = smov [#allocation8]  }
  0x6f   : > { %1563 = vset.pattern.permute.xlu0 %v1747_v2  ;;  %v241_v12 = vrot.slane %v240_v10, 2  ;;  %v247_v13 = vadd.f32 %v246_v11, %v245_v8  ;;  %v349_v37 = vsub.f32 %v280_v30, %v348_v33  ;;  %s1675_s20 = sshll.u32 %s1758_s19, 4  ;;  %s1676_s20 = int_to_ptr.vmem [resolvable:$false] %s1675_s20 }
  0x70   : > { %268 = vperm.xlu0 %1563, %v1964_v1   ;;  %p1673_p1 = pnand %p1672_p2, %p1903_p6  ;;  %s1677_s24 = scalar_lea.vmem %s1676_s20, 32 }
  0x71   : > { %v242_v14 = vadd.f32 %v241_v12, %v240_v10  ;;  %v248_v15 = vrot.slane %v247_v13, 2  ;;  %v350_v38 = vand.u32 4294901760, %v349_v37  ;;  %v761_v12 = vld [vmem:[#allocation7] sm:$0xff]  ;;  %p1678_p8 = scmp.lt.s32.totalorder %s2021_s6, %s1676_s20  ;;  %p1679_p12 = scmp.lt.s32.totalorder %s1677_s24, %s1671_s13 }
  0x72   : > { %1565 = vset.pattern.permute.xlu1 %v1751_v6  ;;  %p1674_p4 = pneg %p1673_p1 }
  0x73   : > { %751 = vperm.xlu1 %1565, %v1964_v1   ;;  %v243_v16 = vrot.slane %v242_v14, 1  ;;  %v249_v17 = vadd.f32 %v248_v15, %v247_v13  ;;  %v351_v39 = vsub.f32 %v349_v37, %v350_v38  ;;  %p1680_p3 = por %p1679_p12, %p1678_p8 }
  0x74   : > { %1567 = vset.pattern.permute.xlu0 %v1753_v47 }
  0x75   : > { %v244_v18 = vadd.f32 %v243_v16, %v242_v14  ;;  %v250_v19 = vrot.slane %v249_v17, 1  ;;  %v352_v41 = vand.u32 4294901760, %v351_v39  ;;  %763 = vperm.xlu0 %1567, %v1964_v1   ;;  %v767_v14 = vsel %vm278_vm1, %v761_v12, 0  ;;  %p1681_p7 = pnand %p1680_p3, %p1674_p4 }
  0x77   : > { %1566 = vset.pattern.permute.xlu1 %v1752_v9  ;;  %v251_v20 = vadd.f32 %v250_v19, %v249_v17  ;;  %v252_v21 = vmul.f32 0.125, %v244_v18  ;;  %v835_v18 = vand.u32 4294901760, %v767_v14 }
  0x78   : > { %756 = vperm.xlu1 %1566, %v1964_v1  }
  0x79   : > { %v253_v22 = vmul.f32 0.125, %v251_v20  ;;  %v254_v23 = vmul.f32 %v252_v21, %v252_v21  ;;  %v257_v27 = vsub.f32 %v238_v5, %v252_v21  ;;  %1570 = vset.pattern.permute.xlu0 %v1756_v50 }
  0x7a   : > { %1249 = vperm.xlu0 %1570, %v1964_v1  }
  0x7b   : > { %v255_v24 = vsub.f32 %v253_v22, %v254_v23  ;;  %v836_v22 = vsub.f32 %v767_v14, %v835_v18 }
  0x7c   : > { %1568 = vset.pattern.permute.xlu1 %v1754_v48 }
  0x7d   : > { %v256_v25 = vmax.f32 %v255_v24, 0.0  ;;  %1238 = vperm.xlu1 %1568, %v1964_v1   ;;  %v837_v23 = vand.u32 4294901760, %v836_v22 }
  0x7e   : > { %1572 = vset.pattern.permute.xlu0 %v1757_v51 }
  0x7f   : > { %v258_v26 = vadd.f32 1e-05, %v256_v25  ;;  %v838_v24 = vsub.f32 %v836_v22, %v837_v23 }
  0x81   : > { %1573 = vrsqrt.f32 %v258_v26  ;;  %1569 = vset.pattern.permute.xlu1 %v1755_v49  ;;  %v839_v26 = vand.u32 4294901760, %v838_v24 }
  0x82   : > { %1243 = vperm.xlu1 %1569, %v1964_v1  }
  0x86   : > { %1571 = vset.pattern.permute.xlu1 %v1757_v51 }
  0x87   : > { %1260 = vperm.xlu1 %1571, %v1964_v1  }
  0x8b   : > { %v1574_v29 = vpop.eup %1573 }
  0x8c   : > { %v260_v31 = vmul.f32 %v1574_v29, %v257_v27 }
  0xea   : > { %v264_v32 = vpop.permute.xlu0 %263 }
  0xeb   : > { %v266_v34 = vmul.f32 %v264_v32, %v260_v31 }
  0xed   : > { %v276_v52 = vpop.permute.xlu1 %275 }
  0xef   : > { %v269_v35 = vpop.permute.xlu0 %268 }
  0xf0   : > { %v271_v36 = vadd.f32 %v269_v35, %v266_v34 }
  0xf2   : > { %1575 = vtanh.f32 %v271_v36  ;;  %v752_v13 = vpop.permute.xlu1 %751 }
  0xf4   : > { %v764_v32 = vpop.permute.xlu0 %763 }
  0xf7   : > { %v757_v19 = vpop.permute.xlu1 %756 }
  0xfc   : > { %v1576_v40 = vpop.eup %1575 }
  0xfd   : > { %v283_v42 = vand.u32 4294901760, %v1576_v40 }
  0xff   : > { %1402 = vmatpush3.msra.mxu0 %v283_v42  ;;  %v360_v43 = vsub.f32 %v1576_v40, %v283_v42 }
 0x100   : > { %1404 = vmatmul.mubr.f32.vlgmr.msra.gmra.mrb[0].mxu0 %v352_v41  ;;  %1406 = vmatprep.subr.mxu0 %v1748_v3 }
 0x101   : > { %v361_v44 = vand.u32 4294901760, %v360_v43  ;;  %1408 = vmatprep.mubr.msk.f32.mxu0 %vm1749_vm0, %v1748_v3 }
 0x103   : > { %v362_v45 = vsub.f32 %v360_v43, %v361_v44 }
 0x105   : > { %v363_v46 = vand.u32 4294901760, %v362_v45 }
 0x107   : > { %1407 = vmatpush3.msra.mxu0 %v363_v46 }
 0x108   : > { %1409 = vmatmul.mubr.f32.vlgmr.msra.gmra.mrb[0].mxu0 %v348_v33  ;;  %1411 = vmatprep.subr.mxu0 %v1748_v3 }
 0x109   : > { %1412 = vmatpush3.msra.mxu0 %v360_v43  ;;  %1413 = vmatprep.mubr.msk.f32.mxu0 %vm1749_vm0, %v1748_v3 }
 0x10a   : > { %1416 = vmatprep.subr.mxu0 %v1748_v3 }
 0x110   : > { %1414 = vmatmul.mubr.f32.vlgmr.msra.gmra.mrb[0].mxu0 %v349_v37 }
 0x111   : > { %1417 = vmatpush3.msra.mxu0 %v283_v42  ;;  %1418 = vmatprep.mubr.msk.f32.mxu0 %vm1749_vm0, %v1748_v3 }
 0x112   : > { %1421 = vmatprep.subr.mxu0 %v1748_v3 }
 0x118   : > { %1419 = vmatmul.mubr.f32.vlgmr.msra.gmra.mrb[0].mxu0 %v350_v38 }
 0x119   : > { %1422 = vmatpush3.msra.mxu0 %v361_v44  ;;  %1423 = vmatprep.mubr.msk.f32.mxu0 %vm1749_vm0, %v1748_v3 }
 0x11a   : > { %1426 = vmatprep.subr.mxu0 %v1748_v3 }
 0x120   : > { %1424 = vmatmul.mubr.f32.vlgmr.msra.gmra.mrb[0].mxu0 %v348_v33 }
 0x121   : > { %1427 = vmatpush3.msra.mxu0 %v283_v42  ;;  %1428 = vmatprep.mubr.msk.f32.mxu0 %vm1749_vm0, %v1748_v3 }
 0x128   : > { %1429 = vmatmul.mubr.f32.vlgmr.msra.gmra.mrb[0].mxu0 %v348_v33 }
 0x1fb   : > { %v724_v53 = vpop.f32.mrb[0].mxu0 }
 0x1fc   : > { %v1461_v54 = vadd.f32 %v724_v53, %v276_v52  ;;  %v1430_v55 = vpop.f32.mrb[1].mxu0 }
 0x1fe   : > { %v728_v56 = vrot.slane %v1461_v54, 4  ;;  %v734_v57 = vmul.f32 %v1461_v54, %v1461_v54 }
 0x200   : > { %v729_v58 = vadd.f32 %v1461_v54, %v728_v56  ;;  %v735_v59 = vrot.slane %v734_v57, 4 }
 0x202   : > { %v730_v60 = vrot.slane %v729_v58, 2  ;;  %v736_v61 = vadd.f32 %v735_v59, %v734_v57 }
 0x204   : > { %v737_v62 = vrot.slane %v736_v61, 2  ;;  %v731_v63 = vadd.f32 %v730_v60, %v729_v58 }
 0x206   : > { %v738_v0 = vadd.f32 %v737_v62, %v736_v61  ;;  %v732_v2 = vrot.slane %v731_v63, 1  ;;  %v1250_v61 = vpop.permute.xlu0 %1249 }
 0x208   : > { %v739_v4 = vrot.slane %v738_v0, 1  ;;  %v733_v5 = vadd.f32 %v732_v2, %v731_v63 }
 0x20a   : > { %v740_v6 = vadd.f32 %v739_v4, %v738_v0  ;;  %v741_v7 = vmul.f32 0.125, %v733_v5 }
 0x20c   : > { %v742_v8 = vmul.f32 0.125, %v740_v6  ;;  %v743_v1 = vmul.f32 %v741_v7, %v741_v7  ;;  %v746_v15 = vsub.f32 %v1461_v54, %v741_v7  ;;  %v1239_v54 = vpop.permute.xlu1 %1238 }
 0x20e   : > { %v744_v9 = vsub.f32 %v742_v8, %v743_v1 }
 0x210   : > { %v745_v10 = vmax.f32 %v744_v9, 0.0  ;;  %v1244_v58 = vpop.permute.xlu1 %1243 }
 0x212   : > { %v747_v11 = vadd.f32 1e-05, %v745_v10 }
 0x214   : > { %1577 = vrsqrt.f32 %v747_v11  ;;  %v1261_v7 = vpop.permute.xlu1 %1260 }
 0x21e   : > { %v1578_v16 = vpop.eup %1577 }
 0x21f   : > { %v749_v17 = vmul.f32 %v1578_v16, %v746_v15 }
 0x221   : > { %v754_v20 = vmul.f32 %v752_v13, %v749_v17 }
 0x223   : > { %v759_v21 = vadd.f32 %v757_v19, %v754_v20 }
 0x225   : > { %1579 = vtanh.f32 %v759_v21 }
 0x22f   : > { %v1580_v25 = vpop.eup %1579 }
 0x230   : > { %v770_v27 = vand.u32 4294901760, %v1580_v25 }
 0x232   : > { %1432 = vmatpush3.msra.mxu1 %v770_v27  ;;  %v847_v28 = vsub.f32 %v1580_v25, %v770_v27 }
 0x233   : > { %1434 = vmatmul.mubr.f32.vlgmr.msra.gmra.mrb[0].mxu1 %v839_v26  ;;  %1436 = vmatprep.subr.mxu1 %v1748_v3 }
 0x234   : > { %v848_v29 = vand.u32 4294901760, %v847_v28  ;;  %1438 = vmatprep.mubr.msk.f32.mxu1 %vm1749_vm0, %v1748_v3 }
 0x236   : > { %v849_v30 = vsub.f32 %v847_v28, %v848_v29 }
 0x238   : > { %v850_v31 = vand.u32 4294901760, %v849_v30 }
 0x23a   : > { %1437 = vmatpush3.msra.mxu1 %v850_v31 }
 0x23b   : > { %1439 = vmatmul.mubr.f32.vlgmr.msra.gmra.mrb[0].mxu1 %v835_v18  ;;  %1441 = vmatprep.subr.mxu1 %v1748_v3 }
 0x23c   : > { %1442 = vmatpush3.msra.mxu1 %v847_v28  ;;  %1443 = vmatprep.mubr.msk.f32.mxu1 %vm1749_vm0, %v1748_v3 }
 0x23d   : > { %1446 = vmatprep.subr.mxu1 %v1748_v3 }
 0x243   : > { %1444 = vmatmul.mubr.f32.vlgmr.msra.gmra.mrb[0].mxu1 %v836_v22 }
 0x244   : > { %1447 = vmatpush3.msra.mxu1 %v770_v27  ;;  %1448 = vmatprep.mubr.msk.f32.mxu1 %vm1749_vm0, %v1748_v3 }
 0x245   : > { %1451 = vmatprep.subr.mxu1 %v1748_v3 }
 0x24b   : > { %1449 = vmatmul.mubr.f32.vlgmr.msra.gmra.mrb[0].mxu1 %v837_v23 }
 0x24c   : > { %1452 = vmatpush3.msra.mxu1 %v848_v29  ;;  %1453 = vmatprep.mubr.msk.f32.mxu1 %vm1749_vm0, %v1748_v3 }
 0x24d   : > { %1456 = vmatprep.subr.mxu1 %v1748_v3 }
 0x253   : > { %1454 = vmatmul.mubr.f32.vlgmr.msra.gmra.mrb[0].mxu1 %v835_v18 }
 0x254   : > { %1457 = vmatpush3.msra.mxu1 %v770_v27  ;;  %1458 = vmatprep.mubr.msk.f32.mxu1 %vm1749_vm0, %v1748_v3 }
 0x25b   : > { %1459 = vmatmul.mubr.f32.vlgmr.msra.gmra.mrb[0].mxu1 %v835_v18 }
 0x32e   : > { %v1211_v33 = vpop.f32.mrb[0].mxu1 }
 0x32f   : > { %v1462_v34 = vadd.f32 %v1211_v33, %v764_v32  ;;  %v1460_v35 = vpop.f32.mrb[1].mxu1 }
 0x331   : > { %v1215_v36 = vrot.slane %v1462_v34, 4  ;;  %v1221_v37 = vmul.f32 %v1462_v34, %v1462_v34 }
 0x333   : > { %v1216_v38 = vadd.f32 %v1462_v34, %v1215_v36  ;;  %v1222_v39 = vrot.slane %v1221_v37, 4 }
 0x335   : > { %v1217_v40 = vrot.slane %v1216_v38, 2  ;;  %v1223_v41 = vadd.f32 %v1222_v39, %v1221_v37 }
 0x337   : > { %v1224_v42 = vrot.slane %v1223_v41, 2  ;;  %v1218_v43 = vadd.f32 %v1217_v40, %v1216_v38 }
 0x339   : > { %v1225_v44 = vadd.f32 %v1224_v42, %v1223_v41  ;;  %v1219_v45 = vrot.slane %v1218_v43, 1 }
 0x33b   : > { %v1226_v46 = vrot.slane %v1225_v44, 1  ;;  %v1220_v47 = vadd.f32 %v1219_v45, %v1218_v43 }
 0x33d   : > { %v1227_v48 = vadd.f32 %v1226_v46, %v1225_v44  ;;  %v1228_v49 = vmul.f32 0.125, %v1220_v47 }
 0x33f   : > { %v1229_v3 = vmul.f32 0.125, %v1227_v48  ;;  %v1230_v50 = vmul.f32 %v1228_v49, %v1228_v49  ;;  %v1233_v55 = vsub.f32 %v1462_v34, %v1228_v49 }
 0x341   : > { %v1231_v51 = vsub.f32 %v1229_v3, %v1230_v50 }
 0x343   : > { %v1232_v52 = vmax.f32 %v1231_v51, 0.0 }
 0x345   : > { %v1234_v53 = vadd.f32 1e-05, %v1232_v52 }
 0x347   : > { %1581 = vrsqrt.f32 %v1234_v53 }
 0x351   : > { %v1582_v56 = vpop.eup %1581 }
 0x352   : > { %v1236_v57 = vmul.f32 %v1582_v56, %v1233_v55 }
 0x354   : > { %v1241_v59 = vmul.f32 %v1239_v54, %v1236_v57 }
 0x356   : > { %v1246_v60 = vadd.f32 %v1244_v58, %v1241_v59 }
 0x358   : > { %1583 = vtanh.f32 %v1246_v60 }
 0x362   : > { %v1584_v62 = vpop.eup %1583 }
 0x363   : > { %v1252_v63 = vmul.f32 %v1584_v62, %v1250_v61 }
 0x365   : > { %v1253_v0 = vrot.slane %v1252_v63, 4 }
 0x367   : > { %v1254_v2 = vadd.f32 %v1253_v0, %v1252_v63 }
 0x369   : > { %v1255_v4 = vrot.slane %v1254_v2, 2 }
 0x36b   : > { %v1256_v5 = vadd.f32 %v1255_v4, %v1254_v2 }
 0x36d   : > { %v1257_v6 = vrot.slane %v1256_v5, 1 }
 0x36f   : > { %v1258_v8 = vadd.f32 %v1257_v6, %v1256_v5 }
 0x371   : > { %v1263_v1 = vadd.f32 %v1261_v7, %v1258_v8 }
 0x373   : > { %1264 = vst [vmem:[%s236_s5] sm:$0x1] %v1263_v1 }
 0x374   : > { %1684 = shalt.err (!%p1681_p7)
}
 0x375   : > { %s1685_s26 = scalar_lea.hbm %s2019_s11, 16  ;;  %s1689_s25 = scalar_lea.hbm %s2067_s4, 32 }
 0x376   : > { %p1686_p10 = scmp.ne.s32.totalorder %s2019_s11, %s1685_s26  ;;  %p1690_p0 = scmp.lt.u32.totalorder %s2019_s11, %s2067_s4 }
 0x377   : > { %p1691_p9 = scmp.lt.u32.totalorder %s1689_s25, %s1685_s26  ;;  %p1693_p2 = scmp.lt.u32.totalorder %s1685_s26, %s2019_s11 }
 0x378   : > { %p1687_p13 = pnand %p1686_p10, %p1903_p6 }
 0x379   : > { %p1692_p11 = por %p1691_p9, %p1690_p0 }
 0x37a   : > { %p1688_p5 = pneg %p1687_p13 }
 0x37b   : > { %p1694_p1 = por %p1693_p2, %p1692_p11 }
 0x37d   : > { %p1695_p4 = pnand %p1694_p1, %p1688_p5 }
 0x37f   : > { %1698 = shalt.err (!%p1695_p4)
}
 0x380   : > { %1493 = dma.vmem_to_hbm [thread:$0]  (%p1903_p6), %s2021_s6, 16, %s2019_s11, %s1266_s14  }
 0x381 PF: > { %s1290_s27 = sand.u32 1, %s1729_s15   ;;  %p2082_p8 = scmp.ne.s32.totalorder %s2072_s22, 0 }
 0x382   : > { %p2083_p12 = scmp.ge.s32.totalorder %s1741_s18, 2  ;;  %s1291_s21 = scalar_lea.sflag [#allocation4], %s1290_s27 }
 0x384   : > { %p1507_p3 = pnand %p2083_p12, %p2082_p8 }
 0x386   : > { %1724 = dma.done.wait (!%p1507_p3), %s1291_s21, 16  }
 0x387   : > { %1726 = vsyncadd (!%p1507_p3), %s1291_s21, 4294967280  ;;  %p18_p7 = scmp.ge.s32.totalorder %s1840_s29, 4   ;;  %s2084_s15 = smov %s1733_s16 }
 0x388   : > { %s2085_s16 = smov %s1737_s17  ;;  %s2086_s17 = smov %s1899_s28 }
 0x389   : > { %s2087_s18 = smov %s1840_s29  ;;  %20 = sbr.rel (!%p18_p7) target bundleno = 6 (0x6), region = 89 }
 0x390   :  { %1295 = vsyncpa [#allocation3], 1 }
 0x391   :  { %1297 = vsyncpa [#allocation3 + $0x1], 1 }
 0x392   :  { %1298 = vsyncpa [#allocation6], 1 }
 0x393   :  { %1299 = vsyncpa [#allocation4], 1 }
 0x394   :  { %1301 = vsyncpa [#allocation4 + $0x1], 1 }

</bundles_post_ra>
